<compile_context>
chip_gen: v6e
topology: v6e:2x2x1
jax: 0.10.0
libtpu: 0.0.40
codegen_flags: <defaults>
</compile_context>

<pallas_src>
import functools

import jax
import jax.numpy as jnp
import numpy as np
from jax.experimental import pallas as pl
from jax.experimental.pallas import tpu as pltpu


def _round_up(v, m):
    return -(-v // m) * m


@functools.lru_cache(maxsize=1)
def _vmem_budget():
    """(tile budget bytes, vmem_limit_bytes), generation aware."""
    try:
        cap = int(pltpu.get_tpu_info().vmem_capacity_bytes)
    except Exception:  # no device / older API -> conservative default
        cap = 64 * 1024 * 1024
    if cap >= 100 * 1024 * 1024:          # v5e / v6e: 128 MiB physical VMEM
        return 64 * 1024 * 1024, 100 * 1024 * 1024
    # v7x-class: 64 MiB physical, 32 MiB scoped default
    return 24 * 1024 * 1024, min(48 * 1024 * 1024, cap)


# ---------------------------------------------------------------------------
# Kernels
# ---------------------------------------------------------------------------
def _matmul_kernel_noacc(x_ref, w_ref, o_ref):
    # Single K block: write the MXU result straight to the output tile.
    o_ref[...] = jnp.dot(
        x_ref[...], w_ref[...], preferred_element_type=jnp.float32
    ).astype(o_ref.dtype)


def _matmul_kernel_acc(x_ref, w_ref, o_ref, acc_ref):
    # K is tiled: accumulate in f32 VMEM scratch, store on the last K step.
    k = pl.program_id(2)

    @pl.when(k == 0)
    def _():
        acc_ref[...] = jnp.zeros_like(acc_ref)

    acc_ref[...] += jnp.dot(
        x_ref[...], w_ref[...], preferred_element_type=jnp.float32
    )

    @pl.when(k == pl.num_programs(2) - 1)
    def _():
        o_ref[...] = acc_ref[...].astype(o_ref.dtype)


# ---------------------------------------------------------------------------
# Tile selection
# ---------------------------------------------------------------------------
def _largest_divisor_tile(dim, cap, unit=128):
    """Largest multiple of `unit` that divides `dim` and is <= cap.

    `dim` must be a multiple of `unit`; result is always >= unit.
    """
    q = dim // unit
    best = unit
    for d in range(1, q + 1):
        t = unit * d
        if q % d == 0 and t <= cap:
            best = t
    return best


def _choose_tiles(mpad0, kpad, npad, in_bytes, out_bytes, budget, m_align):
    """Pick (tm, tn, tk): lane dims are 128-multiples dividing the padded dims."""

    def footprint(tm, tn, tk):
        acc = 0 if tk == kpad else tm * tn * 4
        return (2 * tm * tk * in_bytes      # double-buffered x tiles
                + 2 * tk * tn * in_bytes    # (worst case) double-buffered W tiles
                + 2 * tm * tn * out_bytes   # double-buffered output tiles
                + acc)

    # --- Weight-resident fast path: whole packed W stays in VMEM, single K
    # block, no accumulator. Shrink only tm if needed.
    tm_r = min(mpad0, 512)
    while footprint(tm_r, npad, kpad) > budget and tm_r > m_align:
        tm_r = max(m_align, (tm_r // 2) // m_align * m_align)
    if footprint(tm_r, npad, kpad) <= budget:
        return tm_r, npad, kpad

    # --- General path: tile N first, then M, and only then the contraction
    # dim (keeping tk = kpad avoids the accumulator entirely when possible).
    tm = min(mpad0, 512)
    tn = _largest_divisor_tile(npad, 512)
    tk = kpad
    while footprint(tm, tn, tk) > budget and tn > 128:
        tn = _largest_divisor_tile(npad, tn // 2)
    while footprint(tm, tn, tk) > budget and tm > m_align:
        tm = max(m_align, (tm // 2) // m_align * m_align)
    while footprint(tm, tn, tk) > budget and tk > 128:
        tk = _largest_divisor_tile(kpad, tk // 2)
    return tm, tn, tk


# ---------------------------------------------------------------------------
# Weight packing (do this ONCE, outside the per-call hot path)
# ---------------------------------------------------------------------------
def prepare_weight(weight, *, use_bf16=False):
    """Pack a PyTorch-layout weight (n_features, n_combinations).

    Returns W^T cast to the compute dtype and zero-padded to a
    (128-multiple, 128-multiple) shape (kpad, npad) so the kernel can run a
    standard MXU contraction with lane-dense stores and no per-tile transpose.
    """
    w = jnp.asarray(weight)
    n_feat, n_comb = w.shape
    compute_dtype = jnp.bfloat16 if use_bf16 else w.dtype
    kpad = _round_up(n_comb, 128)
    npad = _round_up(n_feat, 128)
    w_t = w.astype(compute_dtype).T  # (n_combinations, n_features)
    if (kpad, npad) != (n_comb, n_feat):
        w_t = jnp.pad(w_t, ((0, kpad - n_comb), (0, npad - n_feat)))
    return w_t


# ---------------------------------------------------------------------------
# Forward
# ---------------------------------------------------------------------------
@functools.partial(jax.jit, static_argnames=("n_features",))
def coeffs_network_apply(x, w_packed, n_features):
    """y = x @ W.T for a pre-packed weight (see prepare_weight).

    x:        (batch, n_combinations)
    w_packed: (kpad, npad) = padded W^T in the compute dtype
    returns   (batch, n_features) in x.dtype
    """
    batch, n_comb = x.shape
    kpad, npad = w_packed.shape
    assert kpad % 128 == 0 and npad % 128 == 0, "weight must come from prepare_weight"
    assert kpad >= n_comb and npad >= n_features

    out_dtype = x.dtype
    compute_dtype = w_packed.dtype
    in_bytes = jnp.dtype(compute_dtype).itemsize
    out_bytes = jnp.dtype(out_dtype).itemsize
    m_align = 16 if in_bytes < 4 else 8  # bf16 packs 16 rows per sublane pair

    mpad0 = _round_up(batch, m_align)
    budget, vmem_limit = _vmem_budget()
    tm, tn, tk = _choose_tiles(mpad0, kpad, npad, in_bytes, out_bytes, budget, m_align)

    gm = _round_up(mpad0, tm) // tm
    gn = npad // tn
    # Megacore: ensure >= 2 blocks along a parallel axis when the batch allows
    # (keeps both v7x TensorCores busy; negligible cost elsewhere).
    if gm * gn == 1 and mpad0 >= 2 * m_align:
        tm = _round_up(-(-mpad0 // 2), m_align)

    mpad = _round_up(mpad0, tm)
    gm = mpad // tm
    gn = npad // tn
    gk = kpad // tk

    xp = x.astype(compute_dtype)
    if (mpad, kpad) != (batch, n_comb):
        xp = jnp.pad(xp, ((0, mpad - batch), (0, kpad - n_comb)))

    cost = pl.CostEstimate(
        flops=2 * batch * n_comb * n_features,
        transcendentals=0,
        bytes_accessed=(batch * n_comb * in_bytes
                        + kpad * npad * in_bytes
                        + batch * n_features * out_bytes),
    )

    if gk == 1:
        # Single K block: no accumulator, no pl.when. With gn == 1 the weight
        # block index is constant, so W is DMA'd into VMEM once and stays.
        compiler_params = pltpu.CompilerParams(
            dimension_semantics=("parallel", "parallel"),
            vmem_limit_bytes=vmem_limit,
        )
        out_padded = pl.pallas_call(
            _matmul_kernel_noacc,
            out_shape=jax.ShapeDtypeStruct((mpad, npad), out_dtype),
            grid_spec=pltpu.PrefetchScalarGridSpec(
                num_scalar_prefetch=0,
                grid=(gm, gn),
                in_specs=[
                    pl.BlockSpec((tm, kpad), lambda i, j: (i, 0)),  # x tile
                    pl.BlockSpec((kpad, tn), lambda i, j: (0, j)),  # W^T tile
                ],
                out_specs=pl.BlockSpec((tm, tn), lambda i, j: (i, j)),
            ),
            compiler_params=compiler_params,
            cost_estimate=cost,
        )(xp, w_packed)
    else:
        compiler_params = pltpu.CompilerParams(
            dimension_semantics=("parallel", "parallel", "arbitrary"),
            vmem_limit_bytes=vmem_limit,
        )
        out_padded = pl.pallas_call(
            _matmul_kernel_acc,
            out_shape=jax.ShapeDtypeStruct((mpad, npad), out_dtype),
            grid_spec=pltpu.PrefetchScalarGridSpec(
                num_scalar_prefetch=0,
                grid=(gm, gn, gk),
                in_specs=[
                    pl.BlockSpec((tm, tk), lambda i, j, k: (i, k)),  # x tile
                    pl.BlockSpec((tk, tn), lambda i, j, k: (k, j)),  # W^T tile
                ],
                out_specs=pl.BlockSpec((tm, tn), lambda i, j, k: (i, j)),
                scratch_shapes=[pltpu.VMEM((tm, tn), jnp.float32)],
            ),
            compiler_params=compiler_params,
            cost_estimate=cost,
        )(xp, w_packed)

    if (mpad, npad) != (batch, n_features):
        out_padded = out_padded[:batch, :n_features]
    return out_padded


def coeffs_network_forward(x, weight, *, use_bf16=False):
    """Convenience wrapper taking the raw PyTorch-layout weight.

    Prefer prepare_weight(...) + coeffs_network_apply(...) so the one-time
    weight cast/transpose/pad is hoisted out of the per-call hot path.
    """
    n_features = weight.shape[0]
    return coeffs_network_apply(x, prepare_weight(weight, use_bf16=use_bf16), n_features)


if __name__ == "__main__":
    key = jax.random.PRNGKey(0)
    kx, kw, kx2, kw2 = jax.random.split(key, 4)

    # ---- Small shapes consistent with the module's forward ----------------
    batch, n_combinations, n_features = 8, 64, 32
    x = jax.random.normal(kx, (batch, n_combinations), dtype=jnp.float32)
    bound = 1.0 / (n_combinations ** 0.5)
    weight = jax.random.uniform(
        kw, (n_features, n_combinations), dtype=jnp.float32,
        minval=-bound, maxval=bound,
    )

    # Pre-pack the weight once (hoisted out of the hot path).
    w_packed = prepare_weight(weight)
    y = coeffs_network_apply(x, w_packed, n_features)
    jax.block_until_ready(y)

    y_ref = np.asarray(x, np.float64) @ np.asarray(weight, np.float64).T
    assert y.shape == (batch, n_features)
    assert np.allclose(np.asarray(y, np.float64), y_ref, atol=2e-2, rtol=2e-2)

    # ---- Non-aligned shapes: exercises padding + the megacore M split -----
    b2, k2, n2 = 50, 200, 96
    x2 = jax.random.normal(kx2, (b2, k2), dtype=jnp.float32)
    w2 = jax.random.uniform(kw2, (n2, k2), dtype=jnp.float32,
                            minval=-1.0 / (k2 ** 0.5), maxval=1.0 / (k2 ** 0.5))
    y2 = coeffs_network_forward(x2, w2)  # convenience path (packs W internally)
    jax.block_until_ready(y2)
    y2_ref = np.asarray(x2, np.float64) @ np.asarray(w2, np.float64).T
    assert y2.shape == (b2, n2)
    assert np.allclose(np.asarray(y2, np.float64), y2_ref, atol=2e-2, rtol=2e-2)

    # ---- Optional bf16 compute path (f32 accumulation), looser tolerance ---
    y_bf16 = coeffs_network_apply(x, prepare_weight(weight, use_bf16=True), n_features)
    jax.block_until_ready(y_bf16)
    assert np.allclose(np.asarray(y_bf16, np.float64), y_ref, atol=5e-2, rtol=5e-2)

    print("KERNEL_OK")
</pallas_src>

<mosaic_0001>
module attributes {stable_mosaic.version = 11 : i64} {
  func.func @_matmul_kernel_noacc(%arg0: i32, %arg1: i32, %arg2: memref<8x128xf32, #tpu.memory_space<vmem>>, %arg3: memref<128x128xf32, #tpu.memory_space<vmem>>, %arg4: memref<8x128xf32, #tpu.memory_space<vmem>>) attributes {dimension_semantics = [#tpu.dimension_semantics<parallel>, #tpu.dimension_semantics<parallel>], iteration_bounds = array<i64: 1, 1>, scalar_prefetch = 0 : i64, scratch_operands = 0 : i64, tpu.core_type = #tpu.core_type<tc>, window_params = [{transform_indices = @transform_0, window_bounds = array<i64: 8, 128>}, {transform_indices = @transform_1, window_bounds = array<i64: 128, 128>}, {transform_indices = @transform_2, window_bounds = array<i64: 8, 128>}]} {
    %c0 = arith.constant 0 : index
    %c0_0 = arith.constant 0 : index
    %0 = vector.load %arg2[%c0, %c0_0] : memref<8x128xf32, #tpu.memory_space<vmem>>, vector<8x128xf32>
    %c0_1 = arith.constant 0 : index
    %c0_2 = arith.constant 0 : index
    %1 = vector.load %arg3[%c0_1, %c0_2] : memref<128x128xf32, #tpu.memory_space<vmem>>, vector<128x128xf32>
    %cst = arith.constant dense<0.000000e+00> : vector<8x128xf32>
    %2 = tpu.matmul %0, %1, %cst {dimension_numbers = #tpu.dot_dimension_numbers<[1], [0], [0], [1], [0, 0, 1, 1], [], []>} : vector<8x128xf32>, vector<128x128xf32>, vector<8x128xf32> -> vector<8x128xf32>
    %c0_3 = arith.constant 0 : index
    %c0_4 = arith.constant 0 : index
    %3 = vector.load %arg4[%c0_3, %c0_4] : memref<8x128xf32, #tpu.memory_space<vmem>>, vector<8x128xf32>
    tpu.vector_store %arg4[%c0_3, %c0_4], %2 {strides = array<i32>} : memref<8x128xf32, #tpu.memory_space<vmem>>, vector<8x128xf32>,
    return
  }
  func.func @transform_0(%arg0: i32, %arg1: i32) -> (i32, i32) {
    %c0_i32 = arith.constant 0 : i32
    %c0_i32_0 = arith.constant 0 : i32
    return %arg0, %c0_i32 : i32, i32
  }
  func.func @transform_1(%arg0: i32, %arg1: i32) -> (i32, i32) {
    %c0_i32 = arith.constant 0 : i32
    %c0_i32_0 = arith.constant 0 : i32
    return %c0_i32, %arg1 : i32, i32
  }
  func.func @transform_2(%arg0: i32, %arg1: i32) -> (i32, i32) {
    %c0_i32 = arith.constant 0 : i32
    return %arg0, %arg1 : i32, i32
  }
}

</mosaic_0001>

<bundles_post_ra>
// kernel: coeffs_network_apply.1
= control target key start
LH: loop header
LB: loop body
LE: loop exit
PB: predicated region body
PF: predicated region fallthrough
CT: control target
= control target key end

     0   :  { %7 = vsyncpa [#allocation3], 0  ;;  %s261_s0 = inlined_call_operand.vmem [shape: f32[8,128], index: 0, kind: input, shape index: {}]   ;;  %s262_s1 = inlined_call_operand.hbm [shape: f32[128,128], index: 1, kind: input, shape index: {}]   ;;  %s263_s2 = inlined_call_operand.hbm [shape: f32[8,128], index: 2, kind: output, shape index: {}]  }
   0x1   :  { %8 = vsyncpa [#allocation4], 0  ;;  %s231_s9 = smov [#allocation2]  }
   0x2   :  { %s16_s10 = sshll.u32 %s231_s9, 4  ;;  %s17_s10 = int_to_ptr.vmem [resolvable:$true] %s16_s10 }
   0x3   :  { %s195_s11 = scalar_lea.vmem %s17_s10, 2048  ;;  %p200_p1 = scmp.lt.s32.totalorder %s17_s10, %s17_s10 }
   0x4   :  { %p196_p0 = scmp.ne.s32.totalorder %s17_s10, %s195_s11  ;;  %p201_p2 = scmp.lt.s32.totalorder %s195_s11, %s195_s11 }
   0x6   :  { %p202_p3 = por %p201_p2, %p200_p1 }
   0x8   :  { %p203_p4 = pnand %p202_p3, %p196_p0 }
   0xa   :  { %206 = shalt.err (!%p203_p4)
}
   0xb   :  { %s232_s12 = smov 128   ;;  %s233_s13 = smov 8  }
   0xc   :  { %22 = dma.hbm_to_vmem [thread:$0]  %s262_s1, 2048, %s17_s10, [#allocation3], %s232_s12, %s232_s12, %s233_s13  }
   0xd   :  { %227 = dma.done.wait [#allocation3], 2048  }
   0xe   :  { %228 = vsyncadd [#allocation3], 4294965248  ;;  %v234_v0 = vmov 0.0   ;;  %vm235_vm0 = vmmov 0   ;;  %v42_v1 = vld [vmem:[#allocation2 + $0x78] sm:$0xff]  ;;  %v41_v2 = vld [vmem:[#allocation2 + $0x70] sm:$0xff] }
   0xf   :  { %146 = vmatprep.subr.mxu0 %v234_v0  ;;  %178 = vmatprep.mubr.msk.f32.mxu0 %vm235_vm0, %v234_v0  ;;  %v40_v3 = vld [vmem:[#allocation2 + $0x68] sm:$0xff]  ;;  %v39_v4 = vld [vmem:[#allocation2 + $0x60] sm:$0xff]  ;;  %v38_v5 = vld [vmem:[#allocation2 + $0x58] sm:$0xff]  ;;  %s236_s17 = smov [#allocation5]  }
  0x10   :  { %147 = vmatpush3.msra.mxu0 %v42_v1  ;;  %v37_v6 = vld [vmem:[#allocation2 + $0x50] sm:$0xff]  ;;  %v36_v7 = vld [vmem:[#allocation2 + $0x48] sm:$0xff]  ;;  %v35_v8 = vld [vmem:[#allocation2 + $0x40] sm:$0xff]  ;;  %s120_s18 = sshll.u32 %s236_s17, 4  ;;  %s121_s18 = int_to_ptr.vmem [resolvable:$true] %s120_s18 }
  0x11   :  { %148 = vmatprep.subr.mxu0 %v234_v0  ;;  %v34_v9 = vld [vmem:[#allocation2 + $0x38] sm:$0xff]  ;;  %v33_v10 = vld [vmem:[#allocation2 + $0x30] sm:$0xff]  ;;  %v32_v11 = vld [vmem:[#allocation2 + $0x28] sm:$0xff]  ;;  %s207_s19 = scalar_lea.vmem %s121_s18, 128  ;;  %p212_p6 = scmp.lt.s32.totalorder %s121_s18, %s121_s18 }
  0x12   :  { %149 = vmatpush3.msra.mxu0 %v41_v2  ;;  %v31_v12 = vld [vmem:[#allocation2 + $0x20] sm:$0xff]  ;;  %v30_v13 = vld [vmem:[#allocation2 + $0x18] sm:$0xff]  ;;  %v29_v14 = vld [vmem:[#allocation2 + $0x10] sm:$0xff]  ;;  %p208_p5 = scmp.ne.s32.totalorder %s121_s18, %s207_s19  ;;  %p213_p7 = scmp.lt.s32.totalorder %s207_s19, %s207_s19 }
  0x13   :  { %150 = vmatprep.subr.mxu0 %v234_v0  ;;  %v28_v15 = vld [vmem:[#allocation2 + $0x8] sm:$0xff]  ;;  %v27_v16 = vld [vmem:[#allocation2] sm:$0xff] }
  0x14   :  { %151 = vmatpush3.msra.mxu0 %v40_v3  ;;  %v26_v17 = vld [vmem:[%s261_s0] sm:$0xff]  ;;  %p214_p8 = por %p213_p7, %p212_p6 }
  0x15   :  { %152 = vmatprep.subr.mxu0 %v234_v0 }
  0x16   :  { %153 = vmatpush3.msra.mxu0 %v39_v4  ;;  %p215_p9 = pnand %p214_p8, %p208_p5 }
  0x17   :  { %154 = vmatprep.subr.mxu0 %v234_v0 }
  0x18   :  { %155 = vmatpush3.msra.mxu0 %v38_v5 }
  0x19   :  { %156 = vmatprep.subr.mxu0 %v234_v0 }
  0x1a   :  { %157 = vmatpush3.msra.mxu0 %v37_v6 }
  0x1b   :  { %158 = vmatprep.subr.mxu0 %v234_v0 }
  0x1c   :  { %159 = vmatpush3.msra.mxu0 %v36_v7 }
  0x1d   :  { %160 = vmatprep.subr.mxu0 %v234_v0 }
  0x1e   :  { %161 = vmatpush3.msra.mxu0 %v35_v8 }
  0x1f   :  { %162 = vmatprep.subr.mxu0 %v234_v0 }
  0x20   :  { %163 = vmatpush3.msra.mxu0 %v34_v9 }
  0x21   :  { %164 = vmatprep.subr.mxu0 %v234_v0 }
  0x22   :  { %165 = vmatpush3.msra.mxu0 %v33_v10 }
  0x23   :  { %166 = vmatprep.subr.mxu0 %v234_v0 }
  0x24   :  { %167 = vmatpush3.msra.mxu0 %v32_v11 }
  0x25   :  { %168 = vmatprep.subr.mxu0 %v234_v0 }
  0x26   :  { %169 = vmatpush3.msra.mxu0 %v31_v12 }
  0x27   :  { %170 = vmatprep.subr.mxu0 %v234_v0 }
  0x28   :  { %171 = vmatpush3.msra.mxu0 %v30_v13 }
  0x29   :  { %172 = vmatprep.subr.mxu0 %v234_v0 }
  0x2a   :  { %173 = vmatpush3.msra.mxu0 %v29_v14 }
  0x2b   :  { %174 = vmatprep.subr.mxu0 %v234_v0 }
  0x2c   :  { %175 = vmatpush3.msra.mxu0 %v28_v15 }
  0x2d   :  { %176 = vmatprep.subr.mxu0 %v234_v0 }
  0x2e   :  { %177 = vmatpush3.msra.mxu0 %v27_v16 }
  0x2f   :  { %179 = vmatmul.mubr.f32.vlgmr.msra.gmra.mxu0 %v26_v17 }
  0xef   :  { %v109_v18 = vpop.f32.mrf.mxu0 }
  0xf0   :  { %113 = vst [vmem:[#allocation5] sm:$0xff] %v109_v18 }
  0xf1   :  { %v180_v19 = vpop.f32.mrf.mxu0 }
  0xf2   :  { %218 = shalt.err (!%p215_p9)
}
  0xf3   :  { %123 = dma.vmem_to_hbm [thread:$0]  %s121_s18, 128, %s263_s2, [#allocation4]  }
  0xf4   :  { %229 = dma.done.wait [#allocation4], 128  }
  0xf5   :  { %230 = vsyncadd [#allocation4], 4294967168 }
  0xf6   :  { %127 = vsyncpa [#allocation3], 1 }
  0xf7   :  { %128 = vsyncpa [#allocation4], 1 }

</bundles_post_ra>
